<compile_context>
chip_gen: v7x
topology: tpu7x:2x2x1
jax: 0.10.0
libtpu: 0.0.40
codegen_flags: <defaults>
</compile_context>

<pallas_src>
import functools
import math

import jax
import jax.numpy as jnp
from jax.experimental import pallas as pl
from jax.experimental.pallas import tpu as pltpu


def _data_embedding_kernel(x_ref, w_ref, pe_ref, o_ref, *, group_len):
    # x_ref:  (R, c_in)       f32  — R = tb*group_len rows, tb whole batches back to back
    # w_ref:  (3*c_in, d)     bf16 — tap-major flattened conv weight
    # pe_ref: (R, d)          f32  — positional embedding tiled to block height
    # o_ref:  (R, d)
    R, c_in = x_ref.shape
    L = group_len
    x = x_ref[...]  # f32 block, downcast happens in-register after the shifts

    if L == 1:
        left = x
        right = x
    else:
        # Flat circular shifts along the row (sublane) axis via XLU rotates.
        left = pltpu.roll(x, 1 % R, axis=0)            # x[r - 1]
        right = pltpu.roll(x, (R - 1) % R, axis=0)     # x[r + 1]
        if R > L:
            # Patch the rows where the flat roll crossed a batch boundary:
            #   row with (r % L) == 0     wants x[r + L - 1]
            #   row with (r % L) == L - 1 wants x[r - (L - 1)]
            row = jax.lax.broadcasted_iota(jnp.int32, (R, c_in), 0)
            pos = row % L
            left_wrap = pltpu.roll(x, (R - L + 1) % R, axis=0)   # x[r + L - 1]
            right_wrap = pltpu.roll(x, (L - 1) % R, axis=0)      # x[r - (L - 1)]
            left = jnp.where(pos == 0, left_wrap, left)
            right = jnp.where(pos == L - 1, right_wrap, right)

    # im2col (R, 3*c_in): columns [l-1 | l | l+1] match weight rows [tap0 | tap1 | tap2].
    im2col = jnp.concatenate([left, x, right], axis=-1).astype(w_ref.dtype)

    # Single fused MXU matmul (f32 accumulation) + fused positional-embedding add.
    acc = jnp.dot(im2col, w_ref[...], preferred_element_type=jnp.float32)
    o_ref[...] = (acc + pe_ref[...]).astype(o_ref.dtype)


def data_embedding(x, conv_w, pe_full, *, batch_block=None, out_dtype=None,
                   target_block_bytes=6 << 20):
    """x: (B, L, c_in) float32
       conv_w: (d_model, c_in, 3)  (PyTorch Conv1d weight layout)
       pe_full: (max_len, d_model) float32
       returns (B, L, d_model) in out_dtype (default x.dtype)."""
    B, L, c_in = x.shape
    d_model = conv_w.shape[0]
    if out_dtype is None:
        out_dtype = x.dtype
    out_itemsize = jnp.dtype(out_dtype).itemsize

    # Weight re-layout: (d_model, c_in, 3) -> (3, c_in, d_model) -> (3*c_in, d_model);
    # rows [k*c_in:(k+1)*c_in] are tap k (k=0: l-1, k=1: l, k=2: l+1).  Tiny, pre-cast bf16.
    w_flat = jnp.transpose(conv_w, (2, 1, 0)).reshape(3 * c_in, d_model).astype(jnp.bfloat16)

    # --- choose batches per grid block --------------------------------------
    row_bytes = L * d_model * out_itemsize
    if batch_block is None:
        tb = max(1, int(target_block_bytes // max(row_bytes, 1)))
    else:
        tb = int(batch_block)
    tb = max(1, min(tb, B))
    if B >= 2:
        tb = min(tb, pl.cdiv(B, 2))          # >= 2 grid steps so both v7x TCs get work
    align = 8 // math.gcd(L, 8)              # block row count tb*L must be a multiple of 8
    tb = max(align, (tb // align) * align)
    nb = pl.cdiv(B, tb)
    B_pad = nb * tb
    R = tb * L                               # rows per block

    # x flattened to rows (free leading-dim collapse); pad whole batches if needed.
    x2 = x.reshape(B * L, c_in)
    if B_pad != B:
        x2 = jnp.pad(x2, ((0, (B_pad - B) * L), (0, 0)))

    # Positional embedding tiled to block height; f32 for the epilogue add.
    pe_blk = jnp.broadcast_to(pe_full[:L, :].astype(jnp.float32)[None],
                              (tb, L, d_model)).reshape(R, d_model)

    # Explicit VMEM budget: double-buffered x & out, single-buffered w & pe, + slack.
    vmem_bytes = (2 * R * c_in * 4 + 2 * 3 * c_in * d_model * 2
                  + R * d_model * 4 + 2 * R * d_model * out_itemsize + (4 << 20))
    vmem_limit = int(min(max(vmem_bytes, 32 << 20), 64 << 20))

    kernel = functools.partial(_data_embedding_kernel, group_len=L)
    out_flat = pl.pallas_call(
        kernel,
        out_shape=jax.ShapeDtypeStruct((B_pad * L, d_model), out_dtype),
        grid_spec=pltpu.PrefetchScalarGridSpec(
            num_scalar_prefetch=0,
            grid=(nb,),
            in_specs=[
                pl.BlockSpec((R, c_in), lambda i: (i, 0)),
                pl.BlockSpec((3 * c_in, d_model), lambda i: (0, 0),
                             pipeline_mode=pl.Buffered(buffer_count=1)),
                pl.BlockSpec((R, d_model), lambda i: (0, 0),
                             pipeline_mode=pl.Buffered(buffer_count=1)),
            ],
            # NOTE: keep d_model a multiple of 128 in production configs so output
            # stores are unmasked lane-dense vst (typical d_model=512 is).
            out_specs=pl.BlockSpec((R, d_model), lambda i: (i, 0)),
        ),
        compiler_params=pltpu.CompilerParams(
            dimension_semantics=("parallel",),
            vmem_limit_bytes=vmem_limit,
        ),
    )(x2, w_flat, pe_blk)

    return out_flat[: B * L, :].reshape(B, L, d_model)


def make_positional_embedding(d_model, max_len=5000):
    position = jnp.arange(0, max_len, dtype=jnp.float32)[:, None]
    div_term = jnp.exp(
        jnp.arange(0, d_model, 2, dtype=jnp.float32) * -(math.log(10000.0) / d_model))
    pe = jnp.zeros((max_len, d_model), jnp.float32)
    pe = pe.at[:, 0::2].set(jnp.sin(position * div_term))
    pe = pe.at[:, 1::2].set(jnp.cos(position * div_term))
    return pe


def make_conv_weight(key, c_in, d_model):
    # kaiming_normal_(mode='fan_in', nonlinearity='leaky_relu', a=0): std = sqrt(2/fan_in)
    fan_in = c_in * 3
    std = math.sqrt(2.0) / math.sqrt(fan_in)
    return std * jax.random.normal(key, (d_model, c_in, 3), dtype=jnp.float32)


def _reference(x, conv_w, pe_full):
    # Pure-JAX f32 reference: circular conv1d + positional embedding add.
    L = x.shape[1]
    x_ncw = jnp.transpose(x, (0, 2, 1))
    x_pad = jnp.concatenate([x_ncw[:, :, -1:], x_ncw, x_ncw[:, :, :1]], axis=2)
    conv = jax.lax.conv_general_dilated(
        x_pad, conv_w, window_strides=(1,), padding="VALID",
        dimension_numbers=("NCH", "OIH", "NCH"))
    return jnp.transpose(conv, (0, 2, 1)) + pe_full[None, :L, :]


if __name__ == "__main__":
    key = jax.random.PRNGKey(0)
    kx, kw = jax.random.split(key)

    B, L, c_in, d_model = 2, 8, 4, 32
    x = jax.random.normal(kx, (B, L, c_in), dtype=jnp.float32)
    conv_w = make_conv_weight(kw, c_in, d_model)
    pe_full = make_positional_embedding(d_model)

    out = jax.block_until_ready(data_embedding(x, conv_w, pe_full))
    ref = _reference(x, conv_w, pe_full)
    assert out.shape == (B, L, d_model)
    # Relaxed tolerance: MXU operands are bf16 (f32 accumulation), reference is pure f32.
    assert jnp.allclose(out, ref, atol=3e-2, rtol=3e-2)

    # Second case: multiple batches folded into one block (exercises the in-block
    # batch-boundary fix of the circular shifts) and a non-divisible batch count.
    B2 = 5
    x_b = jax.random.normal(jax.random.PRNGKey(1), (B2, L, c_in), dtype=jnp.float32)
    out_b = jax.block_until_ready(data_embedding(x_b, conv_w, pe_full, batch_block=2))
    ref_b = _reference(x_b, conv_w, pe_full)
    assert out_b.shape == (B2, L, d_model)
    assert jnp.allclose(out_b, ref_b, atol=3e-2, rtol=3e-2)

    print("KERNEL_OK")
</pallas_src>

<mosaic_0001>
module attributes {stable_mosaic.version = 11 : i64} {
  func.func @_data_embedding_kernel(%arg0: i32, %arg1: memref<8x4xf32, #tpu.memory_space<vmem>>, %arg2: memref<12x32xbf16, #tpu.memory_space<vmem>>, %arg3: memref<8x32xf32, #tpu.memory_space<vmem>>, %arg4: memref<8x32xf32, #tpu.memory_space<vmem>>) attributes {dimension_semantics = [#tpu.dimension_semantics<parallel>], iteration_bounds = array<i64: 2>, scalar_prefetch = 0 : i64, scratch_operands = 0 : i64, tpu.core_type = #tpu.core_type<tc>, window_params = [{transform_indices = @transform_0, window_bounds = array<i64: 8, 4>}, {pipeline_mode = #tpu.pipeline_mode<synchronous>, transform_indices = @transform_1, window_bounds = array<i64: 12, 32>}, {pipeline_mode = #tpu.pipeline_mode<synchronous>, transform_indices = @transform_2, window_bounds = array<i64: 8, 32>}, {transform_indices = @transform_3, window_bounds = array<i64: 8, 32>}]} {
    %c0 = arith.constant 0 : index
    %c0_0 = arith.constant 0 : index
    %0 = vector.load %arg1[%c0, %c0_0] : memref<8x4xf32, #tpu.memory_space<vmem>>, vector<8x4xf32>
    %c1_i32 = arith.constant 1 : i32
    %1 = tpu.dynamic_rotate %0 by %c1_i32 dim 0 : vector<8x4xf32>, i32 -> vector<8x4xf32>
    %c7_i32 = arith.constant 7 : i32
    %2 = tpu.dynamic_rotate %0 by %c7_i32 dim 0 : vector<8x4xf32>, i32 -> vector<8x4xf32>
    %3 = tpu.concatenate %1, %0, %2 in 1 : vector<8x4xf32>, vector<8x4xf32>, vector<8x4xf32> -> vector<8x12xf32>
    %4 = arith.truncf %3 : vector<8x12xf32> to vector<8x12xbf16>
    %c0_1 = arith.constant 0 : index
    %c0_2 = arith.constant 0 : index
    %5 = vector.load %arg2[%c0_1, %c0_2] : memref<12x32xbf16, #tpu.memory_space<vmem>>, vector<12x32xbf16>
    %cst = arith.constant dense<0.000000e+00> : vector<8x32xf32>
    %6 = tpu.matmul %4, %5, %cst {dimension_numbers = #tpu.dot_dimension_numbers<[1], [0], [0], [1], [0, 0, 1, 1], [], []>} : vector<8x12xbf16>, vector<12x32xbf16>, vector<8x32xf32> -> vector<8x32xf32>
    %c0_3 = arith.constant 0 : index
    %c0_4 = arith.constant 0 : index
    %7 = vector.load %arg3[%c0_3, %c0_4] : memref<8x32xf32, #tpu.memory_space<vmem>>, vector<8x32xf32>
    %8 = arith.addf %6, %7 : vector<8x32xf32>
    %c0_5 = arith.constant 0 : index
    %c0_6 = arith.constant 0 : index
    %9 = vector.load %arg4[%c0_5, %c0_6] : memref<8x32xf32, #tpu.memory_space<vmem>>, vector<8x32xf32>
    tpu.vector_store %arg4[%c0_5, %c0_6], %8 {strides = array<i32>} : memref<8x32xf32, #tpu.memory_space<vmem>>, vector<8x32xf32>,
    return
  }
  func.func @transform_0(%arg0: i32) -> (i32, i32) {
    %c0_i32 = arith.constant 0 : i32
    %c0_i32_0 = arith.constant 0 : i32
    return %arg0, %c0_i32 : i32, i32
  }
  func.func @transform_1(%arg0: i32) -> (i32, i32) {
    %c0_i32 = arith.constant 0 : i32
    %c0_i32_0 = arith.constant 0 : i32
    %c0_i32_1 = arith.constant 0 : i32
    return %c0_i32, %c0_i32_0 : i32, i32
  }
  func.func @transform_2(%arg0: i32) -> (i32, i32) {
    %c0_i32 = arith.constant 0 : i32
    %c0_i32_0 = arith.constant 0 : i32
    %c0_i32_1 = arith.constant 0 : i32
    return %c0_i32, %c0_i32_0 : i32, i32
  }
  func.func @transform_3(%arg0: i32) -> (i32, i32) {
    %c0_i32 = arith.constant 0 : i32
    %c0_i32_0 = arith.constant 0 : i32
    return %arg0, %c0_i32 : i32, i32
  }
}

</mosaic_0001>

<bundles_post_ra>
// kernel: tpu_custom_call.1
= control target key start
LH: loop header
LB: loop body
LE: loop exit
PB: predicated region body
PF: predicated region fallthrough
CT: control target
= control target key end

     0   :  { %8 = vsyncpa [#allocation3], 0  ;;  %s573_s0 = inlined_call_operand.vmem [shape: f32[16,4], index: 0, kind: input, shape index: {}]   ;;  %s574_s1 = inlined_call_operand.vmem [shape: bf16[12,32], index: 1, kind: input, shape index: {}]   ;;  %s575_s2 = inlined_call_operand.vmem [shape: f32[8,32], index: 2, kind: input, shape index: {}]   ;;  %s576_s3 = inlined_call_operand.hbm [shape: f32[16,32], index: 3, kind: output, shape index: {}]  }
   0x1   :  { %10 = vsyncpa [#allocation3 + $0x1], 0  ;;  %s467_s12 = smov 0   ;;  %s469_s13 = smov 0  }
   0x2   :  { %s471_s14 = smov 0   ;;  %s473_s15 = smov 0  }
   0x3 LB: > { %s488_s16 = sadd.s32 4294967295, %s440_s15   ;;  %s314_s17 = sadd.s32 4294967294, %s440_s15   ;;  %s440_s15 = sphi %s473_s15, %s582_s15   ;;  %s436_s14 = sphi %s471_s14, %s581_s14   ;;  %s432_s13 = sphi %s469_s13, %s580_s13   ;;  %s428_s12 = sphi %s467_s12, %s579_s12  }
   0x4   : > { %s492_s18 = sadd.s32 1, %s440_s15   ;;  %s91_s19 = sadd.s32 1, %s436_s14 }
   0x5   : > { %s88_s20 = ssub.s32 %s440_s15, %s492_s18  ;;  %p101_p0 = scmp.ne.s32.totalorder %s436_s14, %s432_s13 }
   0x6   : > { %p89_p1 = scmp.eq.s32.totalorder %s88_s20, 0  ;;  %p102_p2 = scmp.eq.s32.totalorder %s488_s16, 1 }
   0x7   : > { %p107_p3 = scmp.ne.s32.totalorder %s432_s13, %s428_s12  ;;  %p108_p4 = scmp.eq.s32.totalorder %s314_s17, 1 }
   0x8   : > { %s503_s21 = scalar_select %p89_p1, %s436_s14, %s91_s19  }
   0x9   : > { %p505_p5 = por %p102_p2, %p101_p0  ;;  %p509_p6 = por %p108_p4, %p107_p3 }
   0xa   : > { %p317_p7 = scmp.ge.s32.totalorder %s440_s15, 1  ;;  %p139_p8 = scmp.lt.s32.totalorder %s440_s15, 3 }
   0xc   : > { %p140_p9 = pnand %p317_p7, %p139_p8 }
   0xd   : > { %p162_p10 = scmp.lt.s32.totalorder (!%p140_p9), %s488_s16, 1  ;;  %v442_v0 = vmov (!%p140_p9), 0.0   ;;  %vm195_vm0 = vcmask (!%p140_p9), 1045504   ;;  %v377_v1 = vld [vmem:[%s574_s1] sm:$0x3f] (!%p140_p9)   ;;  %vm443_vm1 = vmmov (!%p140_p9), 0  }
   0xe   : > { %143 = sbr.rel (%p140_p9) target bundleno = 376 (0x178), region = 32  ;;  %328 = vmatprep.subr.bf16.mxu0 (!%p140_p9), %v442_v0  ;;  %330 = vmatprep.mubr.msk.bf16.mxu0 (!%p140_p9), %vm443_vm1, %v442_v0  ;;  %v197_v2 = vsel (!%p140_p9), %vm195_vm0, %v377_v1, 0  ;;  %s444_s4 = smov (!%p140_p9), 4   ;;  %vm178_vm2 = vcmask (!%p140_p9), 31744   ;;  %vm180_vm3 = vcmask (!%p140_p9), 64512   ;;  %vm191_vm4 = vcmask (!%p140_p9), 97280  }
   0xf   : > { %329 = vmatpush3.bf16.msra.mxu0 (!%p140_p9), %v197_v2  ;;  %s445_s5 = smov (!%p140_p9), 8   ;;  %s159_s6 = sand.u32 (!%p140_p9), 1, %s432_s13   ;;  %v185_v11 = vld [vmem:[%s575_s2] sm:$0xff] (!%p140_p9)  ;;  %vm239_vm5 = vcmask (!%p140_p9), 261120  }
  0x10   : > { %s318_s7 = sshll.u32 (!%p140_p9), %s159_s6, 3  ;;  %s323_s10 = sshll.u32 (!%p140_p9), %s488_s16, 7 }
  0x11   : > { %s161_s11 = scalar_lea.vmem (!%p140_p9), [#allocation2], %s318_s7  ;;  %s446_s26 = smov (!%p140_p9), [#allocation2]  }
  0x12   : > { %s255_s17 = sshll.u32 (!%p140_p9), %s161_s11, 4  ;;  %s533_s17 = int_to_ptr.vmem [resolvable:$true] %s255_s17 }
  0x13   : > { %s378_s25 = scalar_lea.vmem (!%p140_p9), %s533_s17, 128 }
  0x14   : > { %p379_p11 = scmp.ne.s32.totalorder (!%p140_p9), %s533_s17, %s378_s25 }
  0x15   : > { %s163_s24 = scalar_select %p162_p10, %s488_s16, 1 }
  0x16   : > { %s242_s16 = scalar_lea.sflag [#allocation3], %s159_s6  ;;  %p380_p12 = pnand %p379_p11, %p505_p5 }
  0x17   : > { %s319_s27 = sshll.u32 %s163_s24, 3  ;;  %s531_s24 = scalar_lea.hbm %s576_s3, %s323_s10 }
  0x18   : > { %s165_s30 = scalar_lea.vmem %s573_s0, %s319_s27  ;;  %p381_p13 = pneg %p380_p12 }
  0x19   : > { %v167_v3 = vld [vmem:[%s165_s30] sm:$0xff]  ;;  %s382_s27 = sshll.u32 %s446_s26, 4  ;;  %s383_s27 = int_to_ptr.vmem [resolvable:$false] %s382_s27 }
  0x1a   : > { %171 = vrot.lane.b32.xlu0 %v167_v3, %s444_s4  ;;  %v169_v4 = vrot.slane %v167_v3, 1  ;;  %v168_v5 = vrot.slane %v167_v3, 7  ;;  %s384_s28 = scalar_lea.vmem %s383_s27, 256  ;;  %p385_p0 = scmp.lt.s32.totalorder %s533_s17, %s383_s27 }
  0x1b   : > { %p386_p1 = scmp.lt.s32.totalorder %s384_s28, %s378_s25 }
  0x1d   : > { %p387_p2 = por %p386_p1, %p385_p0 }
  0x1e   : > { %175 = vrot.lane.b32.xlu0 %v169_v4, %s445_s5 }
  0x1f   : > { %p388_p3 = pnand %p387_p2, %p381_p13 }
  0x8c   : > { %v172_v6 = vpop.permute.xlu0 %171 }
  0x8d   : > { %v179_v7 = vsel %vm178_vm2, %v168_v5, %v172_v6 }
  0x90   : > { %v176_v8 = vpop.permute.xlu0 %175 }
  0x91   : > { %v181_v9 = vsel %vm180_vm3, %v179_v7, %v176_v8 }
  0x92   : > { %v182_v10 = vpack.c.bf16 %v181_v9, %v181_v9 }
  0x94   : > { %331 = vmatmul.mubr.msk.bf16.vlgmr.msra.gmra.mrb[0].mxu0 %vm191_vm4, %v182_v10 }
 0x167   : > { %v233_v12 = vpop.f32.mrb[0].mxu0 }
 0x168   : > { %v234_v13 = vadd.f32 %v233_v12, %v185_v11  ;;  %v332_v14 = vpop.f32.mrb[1].mxu0 }
 0x169   : > { %v236_v15 = vpop.f32.mrb[2].mxu0 }
 0x16a   : > { %v333_v16 = vpop.f32.mrb[3].mxu0  ;;  %240 = vst.msk [vmem:[%s161_s11] sm:$0xff] %vm239_vm5, %v234_v13 }
 0x16b   : > { %391 = shalt.err (!%p388_p3)
}
 0x16c   : > { %s392_s29 = scalar_lea.hbm %s531_s24, 128  ;;  %s396_s5 = scalar_lea.hbm %s576_s3, 256 }
 0x16d   : > { %p393_p4 = scmp.ne.s32.totalorder %s531_s24, %s392_s29  ;;  %p397_p9 = scmp.lt.u32.totalorder %s531_s24, %s576_s3 }
 0x16e   : > { %p398_p10 = scmp.lt.u32.totalorder %s396_s5, %s392_s29  ;;  %p400_p12 = scmp.lt.u32.totalorder %s392_s29, %s531_s24 }
 0x16f   : > { %p394_p7 = pnand %p393_p4, %p505_p5 }
 0x170   : > { %p399_p11 = por %p398_p10, %p397_p9 }
 0x171   : > { %p395_p8 = pneg %p394_p7 }
 0x172   : > { %p401_p13 = por %p400_p12, %p399_p11 }
 0x174   : > { %p402_p0 = pnand %p401_p13, %p395_p8 }
 0x176   : > { %405 = shalt.err (!%p402_p0)
}
 0x177   : > { %334 = dma.vmem_to_hbm [thread:$0]  (%p505_p5), %s533_s17, 128, %s531_s24, %s242_s16  }
 0x178 PF: > { %p340_p1 = scmp.ge.s32.totalorder %s440_s15, 2  ;;  %s267_s8 = sand.u32 1, %s428_s12  }
 0x179   : > { %s268_s9 = scalar_lea.sflag [#allocation3], %s267_s8 }
 0x17a   : > { %p337_p2 = pnand %p340_p1, %p509_p6 }
 0x17c   : > { %423 = dma.done.wait (!%p337_p2), %s268_s9, 128  }
 0x17d   : > { %425 = vsyncadd (!%p337_p2), %s268_s9, 4294967168  ;;  %p13_p3 = scmp.ge.s32.totalorder %s492_s18, 4   ;;  %s579_s12 = smov %s432_s13 }
 0x17e   : > { %s580_s13 = smov %s436_s14  ;;  %s581_s14 = smov %s503_s21 }
 0x17f   : > { %s582_s15 = smov %s492_s18  ;;  %15 = sbr.rel (!%p13_p3) target bundleno = 3 (0x3), region = 67 }
 0x186   :  { %273 = vsyncpa [#allocation3], 1 }
 0x187   :  { %275 = vsyncpa [#allocation3 + $0x1], 1 }

</bundles_post_ra>
